<compile_context>
chip_gen: v6e
topology: v6e:2x2x1
jax: 0.10.0
libtpu: 0.0.40
codegen_flags: <defaults>
</compile_context>

<pallas_src>
import jax
import jax.numpy as jnp
from jax.experimental import pallas as pl
from jax.experimental.pallas import tpu as pltpu

_MIB = 1024 * 1024


def _vmem_capacity_bytes() -> int:
    """Physical VMEM per TensorCore (128 MiB v5e/v6e, 64 MiB v7x)."""
    try:
        info = pltpu.get_tpu_info()
        cap = int(getattr(info, "vmem_capacity_bytes", 0))
        if cap > 0:
            return cap
    except Exception:
        pass
    return 64 * _MIB  # conservative (v7x-sized) default


def _sublane_multiple(dtype) -> int:
    # Packed sublane tiling: 8 for 4-byte, 16 for 2-byte, 32 for 1-byte dtypes.
    itemsize = jnp.dtype(dtype).itemsize
    return max(8, 32 // max(itemsize, 1))


# ---------------------------------------------------------------------------
# Path A: single HBM->HBM DMA.  Preferred while the decoder is pure identity.
# ---------------------------------------------------------------------------
def _dma_copy_kernel(x_hbm_ref, o_hbm_ref, copy_sem):
    cp = pltpu.make_async_copy(x_hbm_ref, o_hbm_ref, copy_sem)
    cp.start()
    cp.wait()


def pallas_identity_dma(x: jax.Array) -> jax.Array:
    """Full-array HBM->HBM copy: no VMEM staging, no tiling constraints."""
    nbytes = int(x.size) * jnp.dtype(x.dtype).itemsize
    return pl.pallas_call(
        _dma_copy_kernel,
        out_shape=jax.ShapeDtypeStruct(x.shape, x.dtype),
        in_specs=[pl.BlockSpec(memory_space=pl.ANY)],
        out_specs=pl.BlockSpec(memory_space=pl.ANY),
        scratch_shapes=[pltpu.SemaphoreType.DMA(())],
        cost_estimate=pl.CostEstimate(
            flops=0, transcendentals=0, bytes_accessed=2 * nbytes),
    )(x)


# ---------------------------------------------------------------------------
# Path B: tiled, lane-dense VMEM pipeline.  Scaffolding for a future concrete
# decoder that does real per-tile compute in the kernel body.
# ---------------------------------------------------------------------------
def _copy_kernel(x_ref, o_ref):
    # Placeholder body: pure pass-through of the current VMEM tile.
    o_ref[...] = x_ref[...]


def pallas_identity_copy(x: jax.Array) -> jax.Array:
    """Lane-dense, VMEM-budget-tiled Pallas copy."""
    orig_shape = x.shape
    total = int(x.size)
    itemsize = jnp.dtype(x.dtype).itemsize
    sublane = _sublane_multiple(x.dtype)

    # Widest lane dimension (multiple of 128) that evenly divides the element
    # count -> unmasked `vst` stores.
    lanes = None
    for cand in (2048, 1024, 512, 256, 128):
        if total % cand == 0:
            lanes = cand
            break
    if lanes is None:
        # Cannot form a lane-dense slab without padding: route through the
        # HBM->HBM DMA copy, which has no VMEM / (8,128) constraints and
        # cannot OOM VMEM for large awkward shapes.
        return pallas_identity_dma(x)

    rows = total // lanes
    x2 = x.reshape(rows, lanes)

    # Generation-aware budgets: ~16 MiB blocks on 128-MiB-VMEM chips
    # (v5e/v6e), ~8 MiB on v7x (64 MiB physical).  4 double-buffered tiles
    # (2x in, 2x out) stay well inside the scoped limit we request.
    vmem_cap = _vmem_capacity_bytes()
    block_budget = 16 * _MIB if vmem_cap >= 128 * _MIB else 8 * _MIB
    vmem_limit = min(vmem_cap * 3 // 4, 96 * _MIB)

    max_rows_vmem = max(sublane, block_budget // (lanes * itemsize))
    row_tile = min(rows, max_rows_vmem)

    # Megacore: guarantee >= 2 grid steps when the row count permits, so the
    # "parallel" axis shards DMA issue across both v7x TensorCores.
    if row_tile >= rows and rows >= 2 * sublane:
        half = (rows + 1) // 2
        row_tile = ((half + sublane - 1) // sublane) * sublane

    if row_tile < rows:
        # Partial tiling: keep the row tile a multiple of the packed sublane
        # count so the (8,128)-style block constraint holds.
        row_tile = max(sublane, (row_tile // sublane) * sublane)
    else:
        row_tile = rows  # single block == full dims is always legal

    grid = (pl.cdiv(rows, row_tile),)

    out2 = pl.pallas_call(
        _copy_kernel,
        out_shape=jax.ShapeDtypeStruct((rows, lanes), x.dtype),
        grid=grid,
        in_specs=[pl.BlockSpec((row_tile, lanes), lambda i: (i, 0))],
        out_specs=pl.BlockSpec((row_tile, lanes), lambda i: (i, 0)),
        compiler_params=pltpu.CompilerParams(
            dimension_semantics=("parallel",),
            vmem_limit_bytes=int(vmem_limit),
        ),
        cost_estimate=pl.CostEstimate(
            flops=0, transcendentals=0, bytes_accessed=2 * total * itemsize),
    )(x2)
    return out2.reshape(orig_shape)


# ---------------------------------------------------------------------------
# Decoder interface
# ---------------------------------------------------------------------------
def decoder_forward(x: jax.Array, state, *, pallas_mode: str = "none"):
    """Forward of the (abstract) Decoder: identity on X, state untouched.

    pallas_mode:
      "none" -- return x directly (optimal: zero HBM traffic, no kernel).
      "dma"  -- single HBM->HBM DMA copy kernel.
      "vmem" -- tiled lane-dense VMEM copy kernel (future-compute scaffold).
    """
    if pallas_mode == "dma":
        return pallas_identity_dma(x), state
    if pallas_mode == "vmem":
        return pallas_identity_copy(x), state
    return x, state


class Decoder:
    """JAX mirror of the base encoder-decoder Decoder interface."""

    def __init__(self, pallas_mode: str = "none"):
        self.pallas_mode = pallas_mode

    def init_state(self, enc_outputs, *args):
        # TODO(synk): base class raises NotImplementedError; pass encoder
        # outputs through unchanged as the canonical "state".
        return enc_outputs

    def forward(self, X, state):
        # TODO(synk): base class forward raises NotImplementedError; identity
        # pass-through is the only well-defined behavior to lower.
        return decoder_forward(X, state, pallas_mode=self.pallas_mode)

    __call__ = forward


if __name__ == "__main__":
    key = jax.random.PRNGKey(0)
    batch, seq, hidden = 2, 8, 32
    k_x, k_enc, k_y, k_z = jax.random.split(key, 4)
    X = jax.random.normal(k_x, (batch, seq, hidden), dtype=jnp.float32)
    enc_outputs = jax.random.normal(k_enc, (batch, seq, hidden), dtype=jnp.float32)

    # Optimal (default) path: identity with zero HBM traffic, no kernel launch.
    dec_fast = Decoder(pallas_mode="none")
    state = dec_fast.init_state(enc_outputs)
    out_fast, state_fast = dec_fast(X, state)
    assert out_fast is X and state_fast is enc_outputs

    # HBM->HBM DMA path (preferred Pallas path while the op is pure identity).
    dec_dma = Decoder(pallas_mode="dma")
    state = dec_dma.init_state(enc_outputs)
    out_dma, st_dma = dec_dma(X, state)
    out_dma = jax.block_until_ready(out_dma)
    assert out_dma.shape == X.shape and out_dma.dtype == X.dtype
    assert jnp.allclose(out_dma, X)
    assert jnp.allclose(st_dma, enc_outputs)

    # Tiled VMEM path (scaffolding for a future concrete decoder).
    dec_vmem = Decoder(pallas_mode="vmem")
    state = dec_vmem.init_state(enc_outputs)
    out_vmem, st_vmem = dec_vmem(X, state)
    out_vmem = jax.block_until_ready(out_vmem)
    assert jnp.allclose(out_vmem, X)
    assert jnp.allclose(st_vmem, enc_outputs)

    # Multi-step grid / megacore-split exercise for the VMEM path.
    Z = jax.random.normal(k_z, (128, 256), dtype=jnp.float32)
    out_z = jax.block_until_ready(pallas_identity_copy(Z))
    assert jnp.allclose(out_z, Z)

    # Awkward shape (element count not a multiple of 128): routed to DMA copy.
    Y = jax.random.normal(k_y, (2, 8, 33), dtype=jnp.float32)
    out_y = jax.block_until_ready(pallas_identity_copy(Y))
    assert jnp.allclose(out_y, Y)

    print("KERNEL_OK")
</pallas_src>

<mosaic_0001>
module attributes {stable_mosaic.version = 11 : i64} {
  func.func @_dma_copy_kernel(%arg0: memref<2x8x32xf32, #tpu.memory_space<any>>, %arg1: memref<2x8x32xf32, #tpu.memory_space<any>>, %arg2: memref<!tpu.dma_semaphore, #tpu.memory_space<semaphore_mem>>) attributes {dimension_semantics = [], scalar_prefetch = 0 : i64, scratch_operands = 1 : i64, tpu.core_type = #tpu.core_type<tc>} {
    tpu.enqueue_dma source(%arg0 : memref<2x8x32xf32, #tpu.memory_space<any>>) target(%arg1 : memref<2x8x32xf32, #tpu.memory_space<any>>) target_semaphore(%arg2 : memref<!tpu.dma_semaphore, #tpu.memory_space<semaphore_mem>>)
    tpu.wait_dma2 semaphore(%arg2 : memref<!tpu.dma_semaphore, #tpu.memory_space<semaphore_mem>>) src(%arg0 : memref<2x8x32xf32, #tpu.memory_space<any>>) dst(%arg1 : memref<2x8x32xf32, #tpu.memory_space<any>>)
    return
  }
}

</mosaic_0001>

<bundles_post_ra>
// kernel: tpu_custom_call.1
= control target key start
LH: loop header
LB: loop body
LE: loop exit
PB: predicated region body
PF: predicated region fallthrough
CT: control target
= control target key end

     0   :  { %s29_s6 = smov [#allocation2]   ;;  %s30_s7 = smov 131072   ;;  %s48_s0 = inlined_call_operand.hbm [shape: f32[2,8,32], index: 0, kind: input, shape index: {}]   ;;  %s49_s1 = inlined_call_operand.hbm [shape: f32[2,8,32], index: 1, kind: output, shape index: {}]  }
   0x1   :  { %s31_s8 = smov 0  }
   0x2   :  { %12 = dma.general %s48_s0, 256, %s49_s1, %s29_s6, %s30_s7, [#allocation4], %s31_s8, 0  }
   0x3   :  { %27 = dma.done.wait [#allocation2], 256 }
   0x4   :  { %28 = vsyncadd [#allocation2], 4294967040 }
   0x5   :  { %17 = vsyncmov [#allocation2] }
   0x8   :  { %s18_s13 = vpop.sfrf %17 }
   0x9   :  { %p23_p0 = scmp.ne.s32.totalorder %s18_s13, 0 }
   0xb   :  { %22 = shalt.err (%p23_p0)  }

</bundles_post_ra>
